<compile_context>
chip_gen: v7x
topology: tpu7x:2x2x1
jax: 0.10.0
libtpu: 0.0.40
codegen_flags: <defaults>
</compile_context>

<pallas_src>
import jax
import jax.numpy as jnp
import numpy as np
from jax.experimental import pallas as pl
from jax.experimental.pallas import tpu as pltpu


def _round_up(x, m):
    return ((x + m - 1) // m) * m


# ----------------------------------------------------------------------------
# Pallas kernels
# ----------------------------------------------------------------------------
def _edge_conv_stage1_kernel(fi_ref, gj_ref, wh_ref, bias_ref, out_ref, res_ref):
    """Fused EdgeConv stage 1 (+ fused res_conv).

    Grid: (bs, P//TP), both axes "parallel". The neighbor axis K is folded into
    the body (one lane-dense (1, K, Cout, TP) block per step).

      fi_ref  : (1, C, TP)        center features
      gj_ref  : (1, K, Cout, TP)  gathered, pre-projected neighbors:
                                  gj[k] = (W_b @ feats)[:, idx[:, k]]
      wh_ref  : (2*Cout, C)       rows [W_a - W_b ; W_res]  (res_conv fused)
      bias_ref: (Cout, 1)         conv bias (added in f32)
      out_ref : (1, Cout, TP)     relu((W_a - W_b)@fi + b + max_k gj[k])
      res_ref : (1, Cout, TP)     W_res @ fi (no activation, matches reference)
    """
    cout = out_ref.shape[1]
    kn = gj_ref.shape[1]

    # Hoisted, K-invariant matmul: one (2*Cout, C)@(C, TP) covers h and res.
    hr = jnp.dot(wh_ref[...], fi_ref[0], preferred_element_type=jnp.float32)
    res_ref[0] = hr[cout:].astype(res_ref.dtype)
    h = hr[:cout] + bias_ref[...]                      # (Cout,1) broadcast add (f32)

    # aggregate='max' over neighbors: running max in vregs (VPU only, no MXU).
    m = gj_ref[0, 0].astype(jnp.float32)
    for k in range(1, kn):                             # K is static -> unrolled
        m = jnp.maximum(m, gj_ref[0, k].astype(jnp.float32))

    out_ref[0] = jnp.maximum(h + m, 0.0).astype(out_ref.dtype)


def _edge_conv_stage2_kernel(fi_ref, gj_ref, wh_ref, bias_ref, resin_ref, out_ref):
    """Stage 2: same as stage 1, plus a residual input added before the ReLU."""
    kn = gj_ref.shape[1]
    h = jnp.dot(wh_ref[...], fi_ref[0], preferred_element_type=jnp.float32)
    h = h + bias_ref[...]
    m = gj_ref[0, 0].astype(jnp.float32)
    for k in range(1, kn):
        m = jnp.maximum(m, gj_ref[0, k].astype(jnp.float32))
    out_ref[0] = jnp.maximum(
        h + m + resin_ref[0].astype(jnp.float32), 0.0).astype(out_ref.dtype)


# ----------------------------------------------------------------------------
# Wrapper: one fused EdgeConv stage
# ----------------------------------------------------------------------------
def edge_conv_stage(feats, idx, w_conv, bias, w_res=None, res_in=None,
                    compute_dtype=jnp.float32):
    """Fused EdgeConv stage.

    feats : (bs, C, P)    center features (fi == feats; RadiusGraph scale_factor=1)
    idx   : (bs, P, K)    int32 ball-query neighbor indices
    w_conv: (Cout, 2C)    1x1 Conv2d weight over cat([fi, fj - fi], dim=1)
    bias  : (Cout,)       conv bias
    w_res : (Cout, C)     optional res_conv weight -> returns (out, res)
    res_in: (bs, Cout, P) optional residual added before the ReLU (stage 2)
    """
    bs, c, p = feats.shape
    kn = idx.shape[-1]
    cout = w_conv.shape[0]
    assert w_conv.shape[1] == 2 * c

    # Pick the lane tile first, then pad P to a multiple of it (lane-dense DMAs,
    # no degradation to 128-wide tiles for awkward P).
    tp = min(512, _round_up(p, 128))
    p_pad = _round_up(p, tp)
    n_pt = p_pad // tp
    pad = p_pad - p

    # Algebraic split of the concat matmul:
    #   W @ cat([fi, fj - fi]) = (W_a - W_b) @ fi + W_b @ fj.
    # The fi term is K-invariant (hoisted into the kernel matmul), and the fj
    # term commutes with the neighbor gather, so G = W_b @ feats is computed
    # ONCE over all P and per-neighbor work is only gather + max.
    w_a, w_b = w_conv[:, :c], w_conv[:, c:]
    wh = w_a - w_b                                     # (Cout, C)
    if w_res is not None:
        wh = jnp.concatenate([wh, w_res], axis=0)      # (2*Cout, C), fused res_conv

    feats_pad = jnp.pad(feats, ((0, 0), (0, 0), (0, pad)))
    g = jnp.einsum("oc,bcp->bop", w_b, feats_pad)      # (bs, Cout, Ppad), once
    idx_pad = jnp.pad(idx, ((0, 0), (0, pad), (0, 0)))  # pad rows gather point 0

    # TODO(synk): this column gather of G is still a JAX-side op that writes a
    # (bs, K, Cout, Ppad) tensor to HBM (read once by the kernel); the next step
    # is an in-kernel gather from a VMEM-resident G via scalar-prefetched
    # indices once Mosaic dynamic-gather support is confirmed for this pattern.
    def _per_batch(gb, ix):                            # gb (Cout,Pp), ix (Pp,K)
        return jax.vmap(lambda col: jnp.take(gb, col, axis=1), in_axes=1)(ix)
    gj = jax.vmap(_per_batch)(g, idx_pad)              # (bs, K, Cout, Ppad)

    fi = feats_pad.astype(compute_dtype)
    gj = gj.astype(compute_dtype)
    wh = wh.astype(compute_dtype)
    bias2d = bias[:, None].astype(jnp.float32)         # bias stays f32 (precision)

    grid = (bs, n_pt)
    fi_spec = pl.BlockSpec((1, c, tp), lambda b, pt: (b, 0, pt))
    gj_spec = pl.BlockSpec((1, kn, cout, tp), lambda b, pt: (b, 0, 0, pt))
    wh_spec = pl.BlockSpec(wh.shape, lambda b, pt: (0, 0))
    bias_spec = pl.BlockSpec((cout, 1), lambda b, pt: (0, 0))
    io_spec = pl.BlockSpec((1, cout, tp), lambda b, pt: (b, 0, pt))

    # Right-size the VMEM budget from actual double-buffered block bytes; cap at
    # 48 MiB so it also fits v7x's 64 MiB VMEM with headroom for scratch.
    esz = jnp.dtype(compute_dtype).itemsize
    step_bytes = (c * tp * esz                 # fi block
                  + kn * cout * tp * esz       # gj block
                  + 2 * cout * tp * 4)         # out+res (stage1) or out+resin (stage2)
    vmem_limit = int(min(48 * 1024 * 1024,
                         max(16 * 1024 * 1024, 2 * step_bytes + 2 * 1024 * 1024)))
    cparams = pltpu.CompilerParams(
        dimension_semantics=("parallel", "parallel"),
        vmem_limit_bytes=vmem_limit,
    )

    if w_res is not None:
        out, res = pl.pallas_call(
            _edge_conv_stage1_kernel,
            grid=grid,
            in_specs=[fi_spec, gj_spec, wh_spec, bias_spec],
            out_specs=[io_spec, io_spec],
            out_shape=[jax.ShapeDtypeStruct((bs, cout, p_pad), jnp.float32),
                       jax.ShapeDtypeStruct((bs, cout, p_pad), jnp.float32)],
            compiler_params=cparams,
        )(fi, gj, wh, bias2d)
        return out[:, :, :p], res[:, :, :p]

    assert res_in is not None
    res_pad = jnp.pad(res_in, ((0, 0), (0, 0), (0, pad))).astype(jnp.float32)
    out = pl.pallas_call(
        _edge_conv_stage2_kernel,
        grid=grid,
        in_specs=[fi_spec, gj_spec, wh_spec, bias_spec, io_spec],
        out_specs=io_spec,
        out_shape=jax.ShapeDtypeStruct((bs, cout, p_pad), jnp.float32),
        compiler_params=cparams,
    )(fi, gj, wh, bias2d, res_pad)
    return out[:, :, :p]


# ----------------------------------------------------------------------------
# JAX "glue": graph construction + upsample (torch.no_grad index ops)
# ----------------------------------------------------------------------------
def ball_query(xyz, new_xyz, radius, k):
    """xyz (bs,P,3), new_xyz (bs,Q,3) -> idx (bs,Q,k) int32, filled (bs,Q,k)."""
    d2 = jnp.sum((new_xyz[:, :, None, :] - xyz[:, None, :, :]) ** 2, axis=-1)
    within = d2 < radius ** 2
    rank = jnp.cumsum(within.astype(jnp.int32), axis=-1)
    idx_slots, fill_slots = [], []
    for j in range(k):
        sel = within & (rank == j + 1)
        idx_slots.append(jnp.argmax(sel, axis=-1))
        fill_slots.append(jnp.any(sel, axis=-1))
    idx = jnp.stack(idx_slots, axis=-1)
    filled = jnp.stack(fill_slots, axis=-1)
    # pointnet2 convention: empty slots padded with the first found neighbor.
    # (self is always within radius here, so slot 0 is always filled.)
    idx = jnp.where(filled, idx, idx[..., :1])
    return idx.astype(jnp.int32), filled


def three_nn_upsample(parent_xyz, child_xyz, data):
    """data (bs,C,Pc) interpolated to (bs,C,Pp) via inverse-distance 3-NN."""
    # TODO(synk): PointUpsample('linear') is not defined in the reference source;
    # implemented as PointNet++ three_nn inverse-(squared)-distance interpolation.
    d2 = jnp.sum((parent_xyz[:, :, None, :] - child_xyz[:, None, :, :]) ** 2, axis=-1)
    neg_d, idx = jax.lax.top_k(-d2, 3)
    w = 1.0 / (-neg_d + 1e-8)
    w = w / jnp.sum(w, axis=-1, keepdims=True)                 # (bs, Pp, 3)
    g = jax.vmap(lambda f, i: f[:, i])(data, idx)              # (bs, C, Pp, 3)
    return jnp.sum(g * w[:, None, :, :], axis=-1)


# ----------------------------------------------------------------------------
# Forward pass
# ----------------------------------------------------------------------------
def edge_conv_up_block(xyz, parent_xyz, feats, params, compute_dtype=jnp.float32):
    out_dim = params["w1"].shape[0]

    # stage 1: EdgeConv on input points (grouper1, scale_factor=1) + fused res_conv
    idx1, _ = ball_query(xyz, xyz, params["radius"][0], params["k"][0])
    feats1, res = edge_conv_stage(feats, idx1, params["w1"], params["b1"],
                                  w_res=params["w_res"], compute_dtype=compute_dtype)

    # upsample cat([feats1, res]) to the parent resolution
    data = jnp.concatenate([feats1, res], axis=1)
    data = three_nn_upsample(parent_xyz, xyz, data)
    feats_up, res_up = data[:, :out_dim], data[:, out_dim:]

    # stage 2: EdgeConv on parent points + residual + ReLU (grouper2)
    idx2, _ = ball_query(parent_xyz, parent_xyz, params["radius"][1], params["k"][1])
    out = edge_conv_stage(feats_up, idx2, params["w2"], params["b2"],
                          res_in=res_up, compute_dtype=compute_dtype)
    return parent_xyz, out


def gcn_up_block(xyz, feats, parent_xyz, params):
    """Matches GCNUpBlock.forward(xyz, feats, parent_xyz)."""
    return edge_conv_up_block(xyz, parent_xyz, feats, params)


# ----------------------------------------------------------------------------
# Pure-JAX reference (literal concat + conv + max formulation)
# ----------------------------------------------------------------------------
def _ref_edge_conv(feats, idx, w, b, res_add=None):
    fj = jax.vmap(lambda f, i: f[:, i])(feats, idx)            # (bs, C, P, K)
    fi = feats[..., None]
    edge = jnp.concatenate([jnp.broadcast_to(fi, fj.shape), fj - fi], axis=1)
    y = jnp.einsum("oc,bcpk->bopk", w, edge) + b[None, :, None, None]
    y = jnp.max(y, axis=-1)
    if res_add is not None:
        y = y + res_add
    return jnp.maximum(y, 0.0)


def edge_conv_up_block_ref(xyz, parent_xyz, feats, params):
    out_dim = params["w1"].shape[0]
    idx1, _ = ball_query(xyz, xyz, params["radius"][0], params["k"][0])
    feats1 = _ref_edge_conv(feats, idx1, params["w1"], params["b1"])
    res = jnp.einsum("oc,bcp->bop", params["w_res"], feats)
    data = jnp.concatenate([feats1, res], axis=1)
    data = three_nn_upsample(parent_xyz, xyz, data)
    feats_up, res_up = data[:, :out_dim], data[:, out_dim:]
    idx2, _ = ball_query(parent_xyz, parent_xyz, params["radius"][1], params["k"][1])
    out = _ref_edge_conv(feats_up, idx2, params["w2"], params["b2"], res_add=res_up)
    return parent_xyz, out


# ----------------------------------------------------------------------------
if __name__ == "__main__":
    key = jax.random.PRNGKey(0)
    bs, p0, p1 = 2, 16, 32           # child / parent point counts
    in_dim, out_dim, K = 4, 8, 8
    k1, k2, k3, k4, k5, k6, k7, k8 = jax.random.split(key, 8)

    xyz = jax.random.uniform(k1, (bs, p0, 3), jnp.float32)
    parent_xyz = jax.random.uniform(k2, (bs, p1, 3), jnp.float32)
    feats = jax.random.normal(k3, (bs, in_dim, p0), jnp.float32)

    params = {
        # conv1: Conv2d(2*in_dim -> out_dim, 1x1, bias=True)
        "w1": 0.1 * jax.random.normal(k4, (out_dim, 2 * in_dim), jnp.float32),
        "b1": 0.1 * jax.random.normal(k5, (out_dim,), jnp.float32),
        # conv2: Conv2d(2*out_dim -> out_dim, 1x1, bias=True)
        "w2": 0.1 * jax.random.normal(k6, (out_dim, 2 * out_dim), jnp.float32),
        "b2": 0.1 * jax.random.normal(k7, (out_dim,), jnp.float32),
        # res_conv: Conv1d(in_dim -> out_dim, 1, bias=False)  (out_dim != in_dim)
        "w_res": 0.1 * jax.random.normal(k8, (out_dim, in_dim), jnp.float32),
        "radius": (0.75, 0.75),
        "k": (K, K),
    }

    new_xyz, new_feats = gcn_up_block(xyz, feats, parent_xyz, params)
    jax.block_until_ready(new_feats)

    ref_xyz, ref_feats = edge_conv_up_block_ref(xyz, parent_xyz, feats, params)
    assert new_xyz.shape == (bs, p1, 3)
    assert new_feats.shape == (bs, out_dim, p1)
    np.testing.assert_allclose(np.asarray(new_feats), np.asarray(ref_feats),
                               rtol=1e-4, atol=1e-4)
    print("KERNEL_OK")
</pallas_src>

<mosaic_0001>
module attributes {stable_mosaic.version = 11 : i64} {
  func.func @_edge_conv_stage1_kernel(%arg0: i32, %arg1: i32, %arg2: memref<1x4x128xf32, #tpu.memory_space<vmem>>, %arg3: memref<1x8x8x128xf32, #tpu.memory_space<vmem>>, %arg4: memref<16x4xf32, #tpu.memory_space<vmem>>, %arg5: memref<8x1xf32, #tpu.memory_space<vmem>>, %arg6: memref<1x8x128xf32, #tpu.memory_space<vmem>>, %arg7: memref<1x8x128xf32, #tpu.memory_space<vmem>>) attributes {dimension_semantics = [#tpu.dimension_semantics<parallel>, #tpu.dimension_semantics<parallel>], iteration_bounds = array<i64: 2, 1>, scalar_prefetch = 0 : i64, scratch_operands = 0 : i64, tpu.core_type = #tpu.core_type<tc>, window_params = [{transform_indices = @transform_0, window_bounds = array<i64: 1, 4, 128>}, {transform_indices = @transform_1, window_bounds = array<i64: 1, 8, 8, 128>}, {pipeline_mode = #tpu.pipeline_mode<synchronous>, transform_indices = @transform_2, window_bounds = array<i64: 16, 4>}, {pipeline_mode = #tpu.pipeline_mode<synchronous>, transform_indices = @transform_3, window_bounds = array<i64: 8, 1>}, {transform_indices = @transform_4, window_bounds = array<i64: 1, 8, 128>}, {transform_indices = @transform_5, window_bounds = array<i64: 1, 8, 128>}]} {
    %c0 = arith.constant 0 : index
    %c0_0 = arith.constant 0 : index
    %0 = vector.load %arg4[%c0, %c0_0] : memref<16x4xf32, #tpu.memory_space<vmem>>, vector<16x4xf32>
    %c0_1 = arith.constant 0 : index
    %c0_2 = arith.constant 0 : index
    %c0_3 = arith.constant 0 : index
    %1 = vector.load %arg2[%c0_1, %c0_2, %c0_3] : memref<1x4x128xf32, #tpu.memory_space<vmem>>, vector<1x4x128xf32>
    %2 = vector.shape_cast %1 : vector<1x4x128xf32> to vector<4x128xf32>
    %cst = arith.constant dense<0.000000e+00> : vector<16x128xf32>
    %3 = tpu.matmul %0, %2, %cst {dimension_numbers = #tpu.dot_dimension_numbers<[1], [0], [0], [1], [0, 0, 1, 1], [], []>} : vector<16x4xf32>, vector<4x128xf32>, vector<16x128xf32> -> vector<16x128xf32>
    %4 = vector.extract_strided_slice %3 {offsets = [8, 0], sizes = [8, 128], strides = [1, 1]} : vector<16x128xf32> to vector<8x128xf32>
    %c0_4 = arith.constant 0 : index
    %c0_5 = arith.constant 0 : index
    %c0_6 = arith.constant 0 : index
    %5 = vector.load %arg7[%c0_4, %c0_5, %c0_6] : memref<1x8x128xf32, #tpu.memory_space<vmem>>, vector<1x8x128xf32>
    %6 = vector.shape_cast %5 : vector<1x8x128xf32> to vector<8x128xf32>
    %7 = vector.shape_cast %4 : vector<8x128xf32> to vector<1x8x128xf32>
    tpu.vector_store %arg7[%c0_4, %c0_5, %c0_6], %7 {strides = array<i32>} : memref<1x8x128xf32, #tpu.memory_space<vmem>>, vector<1x8x128xf32>,
    %8 = vector.extract_strided_slice %3 {offsets = [0, 0], sizes = [8, 128], strides = [1, 1]} : vector<16x128xf32> to vector<8x128xf32>
    %c0_7 = arith.constant 0 : index
    %c0_8 = arith.constant 0 : index
    %9 = vector.load %arg5[%c0_7, %c0_8] : memref<8x1xf32, #tpu.memory_space<vmem>>, vector<8x1xf32>
    %10 = vector.broadcast %9 : vector<8x1xf32> to vector<8x128xf32>
    %11 = arith.addf %8, %10 : vector<8x128xf32>
    %c0_9 = arith.constant 0 : index
    %c0_10 = arith.constant 0 : index
    %c0_11 = arith.constant 0 : index
    %c0_12 = arith.constant 0 : index
    %12 = vector.load %arg3[%c0_9, %c0_10, %c0_11, %c0_12] : memref<1x8x8x128xf32, #tpu.memory_space<vmem>>, vector<1x1x8x128xf32>
    %13 = vector.shape_cast %12 : vector<1x1x8x128xf32> to vector<8x128xf32>
    %c0_13 = arith.constant 0 : index
    %c1 = arith.constant 1 : index
    %c0_14 = arith.constant 0 : index
    %c0_15 = arith.constant 0 : index
    %14 = vector.load %arg3[%c0_13, %c1, %c0_14, %c0_15] : memref<1x8x8x128xf32, #tpu.memory_space<vmem>>, vector<1x1x8x128xf32>
    %15 = vector.shape_cast %14 : vector<1x1x8x128xf32> to vector<8x128xf32>
    %16 = arith.maximumf %13, %15 : vector<8x128xf32>
    %c0_16 = arith.constant 0 : index
    %c2 = arith.constant 2 : index
    %c0_17 = arith.constant 0 : index
    %c0_18 = arith.constant 0 : index
    %17 = vector.load %arg3[%c0_16, %c2, %c0_17, %c0_18] : memref<1x8x8x128xf32, #tpu.memory_space<vmem>>, vector<1x1x8x128xf32>
    %18 = vector.shape_cast %17 : vector<1x1x8x128xf32> to vector<8x128xf32>
    %19 = arith.maximumf %16, %18 : vector<8x128xf32>
    %c0_19 = arith.constant 0 : index
    %c3 = arith.constant 3 : index
    %c0_20 = arith.constant 0 : index
    %c0_21 = arith.constant 0 : index
    %20 = vector.load %arg3[%c0_19, %c3, %c0_20, %c0_21] : memref<1x8x8x128xf32, #tpu.memory_space<vmem>>, vector<1x1x8x128xf32>
    %21 = vector.shape_cast %20 : vector<1x1x8x128xf32> to vector<8x128xf32>
    %22 = arith.maximumf %19, %21 : vector<8x128xf32>
    %c0_22 = arith.constant 0 : index
    %c4 = arith.constant 4 : index
    %c0_23 = arith.constant 0 : index
    %c0_24 = arith.constant 0 : index
    %23 = vector.load %arg3[%c0_22, %c4, %c0_23, %c0_24] : memref<1x8x8x128xf32, #tpu.memory_space<vmem>>, vector<1x1x8x128xf32>
    %24 = vector.shape_cast %23 : vector<1x1x8x128xf32> to vector<8x128xf32>
    %25 = arith.maximumf %22, %24 : vector<8x128xf32>
    %c0_25 = arith.constant 0 : index
    %c5 = arith.constant 5 : index
    %c0_26 = arith.constant 0 : index
    %c0_27 = arith.constant 0 : index
    %26 = vector.load %arg3[%c0_25, %c5, %c0_26, %c0_27] : memref<1x8x8x128xf32, #tpu.memory_space<vmem>>, vector<1x1x8x128xf32>
    %27 = vector.shape_cast %26 : vector<1x1x8x128xf32> to vector<8x128xf32>
    %28 = arith.maximumf %25, %27 : vector<8x128xf32>
    %c0_28 = arith.constant 0 : index
    %c6 = arith.constant 6 : index
    %c0_29 = arith.constant 0 : index
    %c0_30 = arith.constant 0 : index
    %29 = vector.load %arg3[%c0_28, %c6, %c0_29, %c0_30] : memref<1x8x8x128xf32, #tpu.memory_space<vmem>>, vector<1x1x8x128xf32>
    %30 = vector.shape_cast %29 : vector<1x1x8x128xf32> to vector<8x128xf32>
    %31 = arith.maximumf %28, %30 : vector<8x128xf32>
    %c0_31 = arith.constant 0 : index
    %c7 = arith.constant 7 : index
    %c0_32 = arith.constant 0 : index
    %c0_33 = arith.constant 0 : index
    %32 = vector.load %arg3[%c0_31, %c7, %c0_32, %c0_33] : memref<1x8x8x128xf32, #tpu.memory_space<vmem>>, vector<1x1x8x128xf32>
    %33 = vector.shape_cast %32 : vector<1x1x8x128xf32> to vector<8x128xf32>
    %34 = arith.maximumf %31, %33 : vector<8x128xf32>
    %35 = arith.addf %11, %34 : vector<8x128xf32>
    %cst_34 = arith.constant 0.000000e+00 : f32
    %36 = vector.broadcast %cst_34 : f32 to vector<8x128xf32>
    %37 = arith.maximumf %35, %36 : vector<8x128xf32>
    %c0_35 = arith.constant 0 : index
    %c0_36 = arith.constant 0 : index
    %c0_37 = arith.constant 0 : index
    %38 = vector.load %arg6[%c0_35, %c0_36, %c0_37] : memref<1x8x128xf32, #tpu.memory_space<vmem>>, vector<1x8x128xf32>
    %39 = vector.shape_cast %38 : vector<1x8x128xf32> to vector<8x128xf32>
    %40 = vector.shape_cast %37 : vector<8x128xf32> to vector<1x8x128xf32>
    tpu.vector_store %arg6[%c0_35, %c0_36, %c0_37], %40 {strides = array<i32>} : memref<1x8x128xf32, #tpu.memory_space<vmem>>, vector<1x8x128xf32>,
    return
  }
  func.func @transform_0(%arg0: i32, %arg1: i32) -> (i32, i32, i32) {
    %c0_i32 = arith.constant 0 : i32
    %c0_i32_0 = arith.constant 0 : i32
    return %arg0, %c0_i32, %arg1 : i32, i32, i32
  }
  func.func @transform_1(%arg0: i32, %arg1: i32) -> (i32, i32, i32, i32) {
    %c0_i32 = arith.constant 0 : i32
    %c0_i32_0 = arith.constant 0 : i32
    %c0_i32_1 = arith.constant 0 : i32
    return %arg0, %c0_i32, %c0_i32_0, %arg1 : i32, i32, i32, i32
  }
  func.func @transform_2(%arg0: i32, %arg1: i32) -> (i32, i32) {
    %c0_i32 = arith.constant 0 : i32
    %c0_i32_0 = arith.constant 0 : i32
    %c0_i32_1 = arith.constant 0 : i32
    return %c0_i32, %c0_i32_0 : i32, i32
  }
  func.func @transform_3(%arg0: i32, %arg1: i32) -> (i32, i32) {
    %c0_i32 = arith.constant 0 : i32
    %c0_i32_0 = arith.constant 0 : i32
    %c0_i32_1 = arith.constant 0 : i32
    return %c0_i32, %c0_i32_0 : i32, i32
  }
  func.func @transform_4(%arg0: i32, %arg1: i32) -> (i32, i32, i32) {
    %c0_i32 = arith.constant 0 : i32
    %c0_i32_0 = arith.constant 0 : i32
    return %arg0, %c0_i32, %arg1 : i32, i32, i32
  }
  func.func @transform_5(%arg0: i32, %arg1: i32) -> (i32, i32, i32) {
    %c0_i32 = arith.constant 0 : i32
    %c0_i32_0 = arith.constant 0 : i32
    return %arg0, %c0_i32, %arg1 : i32, i32, i32
  }
}

</mosaic_0001>

<bundles_post_ra>
// kernel: tpu_custom_call.1
= control target key start
LH: loop header
LB: loop body
LE: loop exit
PB: predicated region body
PF: predicated region fallthrough
CT: control target
= control target key end

     0   :  { %11 = vsyncpa [#allocation3], 0  ;;  %s1111_s0 = inlined_call_operand.vmem [shape: f32[2,4,128], index: 0, kind: input, shape index: {}]   ;;  %s1112_s1 = inlined_call_operand.hbm [shape: f32[2,8,8,128], index: 1, kind: input, shape index: {}]   ;;  %s1113_s2 = inlined_call_operand.vmem [shape: f32[16,4], index: 2, kind: input, shape index: {}]   ;;  %s1114_s3 = inlined_call_operand.vmem [shape: f32[8,1], index: 3, kind: input, shape index: {}]   ;;  %s1115_s4 = inlined_call_operand.hbm [shape: f32[2,8,128], index: 4, kind: output, shape index: {0}]   ;;  %s1116_s5 = inlined_call_operand.hbm [shape: f32[2,8,128], index: 5, kind: output, shape index: {1}]  }
   0x1   :  { %13 = vsyncpa [#allocation3 + $0x1], 0 }
   0x2   :  { %14 = vsyncpa [#allocation4], 0 }
   0x3   :  { %16 = vsyncpa [#allocation4 + $0x1], 0 }
   0x4   :  { %17 = vsyncpa [#allocation7], 0 }
   0x5   :  { %19 = vsyncpa [#allocation7 + $0x1], 0  ;;  %s876_s18 = smov 0   ;;  %s878_s19 = smov 0  }
   0x6   :  { %s880_s20 = smov 0   ;;  %s882_s21 = smov 0  }
   0x7   :  { %s884_s22 = smov 0   ;;  %s886_s23 = smov 0  }
   0x8 LB: > { %s586_s24 = sadd.s32 4294967295, %s838_s23   ;;  %s587_s25 = sadd.s32 4294967294, %s838_s23   ;;  %s838_s23 = sphi %s886_s23, %s25_s23   ;;  %s834_s22 = sphi %s884_s22, %s1131_s22   ;;  %s830_s21 = sphi %s882_s21, %s1130_s21   ;;  %s826_s20 = sphi %s880_s20, %s1129_s20   ;;  %s822_s19 = sphi %s878_s19, %s1128_s19   ;;  %s818_s18 = sphi %s876_s18, %s1127_s18  }
   0x9   : > { %s37_s26 = sadd.s32 1, %s834_s22  ;;  %s74_s27 = sadd.s32 1, %s826_s20 }
   0xa   : > { %p39_p0 = scmp.ge.s32.totalorder %s37_s26, 2  ;;  %p81_p1 = scmp.ne.s32.totalorder %s826_s20, %s822_s19 }
   0xb   : > { %p82_p2 = scmp.eq.s32.totalorder %s838_s23, 0  ;;  %p87_p3 = scmp.ne.s32.totalorder %s822_s19, %s818_s18 }
   0xc   : > { %s1133_s26 = smov (%p39_p0, %s37_s26), 0  ;;  %p88_p5 = scmp.eq.s32.totalorder %s586_s24, 0 }
   0xd   : > { %p917_p4 = por %p82_p2, %p81_p1  ;;  %s69_s29 = ssub.s32 %s834_s22, %s1133_s26 }
   0xe   : > { %p155_p6 = scmp.eq.s32.totalorder %s586_s24, 1  ;;  %p72_p7 = scmp.eq.s32.totalorder %s69_s29, 0 }
   0xf   : > { %p923_p8 = por %p88_p5, %p87_p3  ;;  %p161_p10 = scmp.eq.s32.totalorder %s587_s25, 1 }
  0x10   : > { %p927_p9 = por %p155_p6, %p81_p1  ;;  %p640_p13 = scmp.lt.s32.totalorder %s838_s23, 2 }
  0x11   : > { %s932_s7 = scalar_select %p72_p7, %s826_s20, %s74_s27  }
  0x12   : > { %s1120_s6 = scalar_select %p927_p9, 1, 0 }
  0x13   : > { %p934_p11 = por %p161_p10, %p87_p3  ;;  %s225_s9 = sand.u32 1, %s826_s20  }
  0x14   : > { %s590_s10 = sshll.u32 %s225_s9, 6  ;;  %s614_s11 = sshll.u32 %s834_s22, 10 }
  0x15   : > { %s1121_s8 = scalar_select %p934_p11, 1, 0 }
  0x16   : > { %s945_s14 = scalar_lea.hbm %s1112_s1, %s614_s11  ;;  %s229_s15 = scalar_lea.vmem [#allocation2], %s590_s10 }
  0x17   : > { %s237_s16 = sshll.u32 %s229_s15, 4  ;;  %p951_p0 = pnand %p640_p13, %p917_p4  ;;  %s947_s16 = int_to_ptr.vmem [resolvable:$true] %s237_s16 }
  0x18   : > { %s956_s24 = scalar_lea.sflag [#allocation3], %s225_s9  ;;  %s694_s25 = scalar_lea.hbm %s945_s14, 1024 }
  0x19   : > { %p695_p2 = scmp.ne.s32.totalorder %s945_s14, %s694_s25  ;;  %p696_p3 = pneg %p951_p0 }
  0x1a   : > { %s699_s28 = scalar_lea.hbm %s1112_s1, 2048  ;;  %p700_p4 = scmp.lt.u32.totalorder %s945_s14, %s1112_s1 }
  0x1b   : > { %p697_p5 = pnand %p696_p3, %p695_p2  ;;  %p701_p7 = scmp.lt.u32.totalorder %s699_s28, %s694_s25 }
  0x1c   : > { %p703_p13 = scmp.lt.u32.totalorder %s694_s25, %s945_s14 }
  0x1d   : > { %p698_p6 = pneg %p697_p5  ;;  %p702_p10 = por %p701_p7, %p700_p4 }
  0x1f   : > { %p704_p12 = por %p703_p13, %p702_p10 }
  0x21   : > { %p705_p1 = pnand %p704_p12, %p698_p6 }
  0x23   : > { %708 = shalt.err (!%p705_p1)
}
  0x24   : > { %s709_s9 = scalar_lea.vmem %s947_s16, 1024  ;;  %s840_s12 = smov [#allocation2]  }
  0x25   : > { %p710_p2 = scmp.ne.s32.totalorder %s947_s16, %s709_s9  ;;  %s714_s13 = sshll.u32 %s840_s12, 4  ;;  %s715_s13 = int_to_ptr.vmem [resolvable:$false] %s714_s13 }
  0x26   : > { %s716_s15 = scalar_lea.vmem %s715_s13, 2048  ;;  %p717_p9 = scmp.lt.s32.totalorder %s947_s16, %s715_s13 }
  0x27   : > { %p712_p5 = pnand %p710_p2, %p696_p3  ;;  %p718_p4 = scmp.lt.s32.totalorder %s716_s15, %s709_s9 }
  0x29   : > { %p713_p11 = pneg %p712_p5  ;;  %p719_p7 = por %p718_p4, %p717_p9 }
  0x2b   : > { %p720_p10 = pnand %p719_p7, %p713_p11 }
  0x2d   : > { %723 = shalt.err (!%p720_p10)
}
  0x2e   : > { %s841_s25 = smov 128   ;;  %s842_s27 = smov 8  }
  0x2f   : > { %632 = dma.hbm_to_vmem [thread:$0]  (!%p951_p0), %s945_s14, 1024, %s947_s16, %s956_s24, %s841_s25, %s841_s25, %s842_s27  }
  0x30   : > { %p245_p12 = scmp.lt.s32.totalorder %s838_s23, 3  ;;  %p1123_p1 = scmp.ge.s32.totalorder %s838_s23, 1 }
  0x32   : > { %p246_p3 = pnand %p1123_p1, %p245_p12 }
  0x33   : > { %s988_s29 = sand.u32 (!%p246_p3), 1, %s822_s19  }
  0x34   : > { %249 = sbr.rel (%p246_p3) target bundleno = 320 (0x140), region = 36  ;;  %s594_s28 = sshll.u32 (!%p246_p3), %s988_s29, 6 }
  0x35   : > { %s252_s10 = scalar_lea.sflag (!%p246_p3), [#allocation3], %s988_s29  ;;  %s992_s11 = scalar_lea.vmem (!%p246_p3), [#allocation2], %s594_s28 }
  0x3b   : > { %805 = dma.done.wait (%p923_p8), %s252_s10, 1024  }
  0x3c   : > { %807 = vsyncadd (%p923_p8), %s252_s10, 4294966272  ;;  %p294_p9 = scmp.lt.s32.totalorder %s830_s21, 1  ;;  %v843_v0 = vmov 0   ;;  %vm311_vm0 = vcmask 1043456   ;;  %vm304_vm1 = vcmask 31744   ;;  %v301_v2 = vld [vmem:[%s1113_s2] sm:$0xff] }
  0x3d   : > { %693 = vset.pattern.permute.xlu0 %v843_v0  ;;  %v302_v3 = vld [vmem:[%s1113_s2 + $0x8] sm:$0xff]  ;;  %620 = vmatprep.mubr.msk.f32.mxu0 %vm304_vm1, %v301_v2  ;;  %v391_v4 = vld [vmem:[%s1114_s3] sm:$0xff]  ;;  %v602_v8 = vld [vmem:[%s992_s11 + $0x10] sm:$0xff]  ;;  %s595_s28 = sshll.u32 %s988_s29, 3  ;;  %s429_s30 = scalar_lea.sflag [#allocation7], %s988_s29 }
  0x3e   : > { %s295_s14 = scalar_select %p294_p9, %s830_s21, 1  ;;  %394 = vperm.xlu0 %693, %v391_v4   ;;  %v398_v5 = vld [vmem:[%s992_s11] sm:$0xff]  ;;  %v601_v6 = vld [vmem:[%s992_s11 + $0x8] sm:$0xff]  ;;  %v603_v10 = vld [vmem:[%s992_s11 + $0x18] sm:$0xff] }
  0x3f   : > { %v401_v7 = vmax.f32 %v398_v5, %v601_v6  ;;  %v604_v12 = vld [vmem:[%s992_s11 + $0x20] sm:$0xff]  ;;  %v605_v14 = vld [vmem:[%s992_s11 + $0x28] sm:$0xff]  ;;  %v606_v16 = vld [vmem:[%s992_s11 + $0x30] sm:$0xff]  ;;  %s293_s10 = scalar_lea.vmem [#allocation6], %s595_s28  ;;  %p1124_p11 = scmp.ne.s32.totalorder %s1120_s6, 0 }
  0x40   : > { %s597_s16 = sshll.u32 %s295_s14, 2  ;;  %s457_s14 = sshll.u32 %s293_s10, 4  ;;  %v607_v18 = vld [vmem:[%s992_s11 + $0x38] sm:$0xff]  ;;  %s1024_s14 = int_to_ptr.vmem [resolvable:$true] %s457_s14 }
  0x41   : > { %s300_s9 = scalar_lea.vmem %s1111_s0, %s597_s16  ;;  %v404_v9 = vmax.f32 %v401_v7, %v602_v8  ;;  %s610_s16 = sshll.u32 %s830_s21, 7 }
  0x42   : > { %v303_v1 = vld [vmem:[%s300_s9] sm:$0xf]  ;;  %s1031_s9 = scalar_lea.hbm %s1116_s5, %s610_s16  ;;  %s724_s12 = scalar_lea.vmem %s1024_s14, 128 }
  0x43   : > { %618 = vmatprep.subr.msk.mxu0 %vm311_vm0, %v303_v1  ;;  %v407_v11 = vmax.f32 %v404_v9, %v603_v10  ;;  %p725_p8 = scmp.ne.s32.totalorder %s1024_s14, %s724_s12  ;;  %s844_s11 = smov [#allocation6]  }
  0x44   : > { %619 = vmatpush3.msk.msra.mxu0 %vm311_vm0, %v303_v1  ;;  %s728_s13 = sshll.u32 %s844_s11, 4  ;;  %s729_s13 = int_to_ptr.vmem [resolvable:$false] %s728_s13 }
  0x45   : > { %621 = vmatmul.mubr.msk.f32.vlgmr.msra.gmra.mrb[0].mxu0 %vm304_vm1, %v302_v3  ;;  %v410_v13 = vmax.f32 %v407_v11, %v604_v12  ;;  %p726_p0 = pnand %p725_p8, %p1124_p11  ;;  %s730_s15 = scalar_lea.vmem %s729_s13, 256 }
  0x46   : > { %p731_p13 = scmp.lt.s32.totalorder %s1024_s14, %s729_s13  ;;  %p732_p2 = scmp.lt.s32.totalorder %s730_s15, %s724_s12 }
  0x47   : > { %v413_v15 = vmax.f32 %v410_v13, %v605_v14  ;;  %p727_p6 = pneg %p726_p0 }
  0x48   : > { %p733_p5 = por %p732_p2, %p731_p13 }
  0x49   : > { %v416_v17 = vmax.f32 %v413_v15, %v606_v16 }
  0x4a   : > { %p734_p4 = pnand %p733_p5, %p727_p6 }
  0x4b   : > { %v419_v21 = vmax.f32 %v416_v17, %v607_v18 }
  0xbd   : > { %v395_v19 = vpop.permute.xlu0 %394 }
 0x118   : > { %v622_v20 = vpop.f32.mrb[0].mxu0 }
 0x119   : > { %390 = vst [vmem:[%s293_s10] sm:$0xff] %v622_v20  ;;  %v381_v22 = vpop.f32.mrb[1].mxu0 }
 0x11a   : > { %v397_v23 = vadd.f32 %v395_v19, %v381_v22 }
 0x11b   : > { %737 = shalt.err (!%p734_p4)
}
 0x11c   : > { %s738_s25 = scalar_lea.hbm %s1031_s9, 128  ;;  %s742_s17 = scalar_lea.hbm %s1116_s5, 256 }
 0x11d   : > { %p739_p7 = scmp.ne.s32.totalorder %s1031_s9, %s738_s25  ;;  %p743_p1 = scmp.lt.u32.totalorder %s1031_s9, %s1116_s5 }
 0x11e   : > { %p744_p3 = scmp.lt.u32.totalorder %s742_s17, %s738_s25  ;;  %p746_p8 = scmp.lt.u32.totalorder %s738_s25, %s1031_s9 }
 0x11f   : > { %p740_p10 = pnand %p739_p7, %p1124_p11 }
 0x120   : > { %p745_p9 = por %p744_p3, %p743_p1 }
 0x121   : > { %p741_p12 = pneg %p740_p10 }
 0x122   : > { %p747_p0 = por %p746_p8, %p745_p9 }
 0x124   : > { %p748_p6 = pnand %p747_p0, %p741_p12 }
 0x126   : > { %751 = shalt.err (!%p748_p6)
}
 0x127   : > { %626 = dma.vmem_to_hbm [thread:$0]  (%p1124_p11), %s1024_s14, 128, %s1031_s9, %s429_s30   ;;  %v420_v24 = vadd.f32 %v419_v21, %v397_v23 }
 0x128   : > { %s286_s12 = scalar_lea.vmem [#allocation5], %s595_s28  ;;  %s1062_s27 = scalar_lea.hbm %s1115_s4, %s610_s16 }
 0x129   : > { %s443_s13 = sshll.u32 %s286_s12, 4  ;;  %v421_v25 = vmax.f32 %v420_v24, 0.0  ;;  %s424_s10 = scalar_lea.sflag [#allocation4], %s988_s29  ;;  %s1064_s13 = int_to_ptr.vmem [resolvable:$true] %s443_s13 }
 0x12a   : > { %s752_s17 = scalar_lea.vmem %s1064_s13, 128  ;;  %s845_s28 = smov [#allocation5]  }
 0x12b   : > { %422 = vst [vmem:[%s286_s12] sm:$0xff] %v421_v25  ;;  %p753_p13 = scmp.ne.s32.totalorder %s1064_s13, %s752_s17  ;;  %s756_s14 = sshll.u32 %s845_s28, 4  ;;  %s757_s14 = int_to_ptr.vmem [resolvable:$false] %s756_s14 }
 0x12c   : > { %s758_s21 = scalar_lea.vmem %s757_s14, 256  ;;  %p759_p4 = scmp.lt.s32.totalorder %s1064_s13, %s757_s14 }
 0x12d   : > { %p754_p2 = pnand %p753_p13, %p1124_p11  ;;  %p760_p7 = scmp.lt.s32.totalorder %s758_s21, %s752_s17 }
 0x12f   : > { %p755_p5 = pneg %p754_p2  ;;  %p761_p10 = por %p760_p7, %p759_p4 }
 0x131   : > { %p762_p12 = pnand %p761_p10, %p755_p5 }
 0x133   : > { %765 = shalt.err (!%p762_p12)
}
 0x134   : > { %s766_s29 = scalar_lea.hbm %s1062_s27, 128  ;;  %s770_s30 = scalar_lea.hbm %s1115_s4, 256 }
 0x135   : > { %p767_p1 = scmp.ne.s32.totalorder %s1062_s27, %s766_s29  ;;  %p771_p8 = scmp.lt.u32.totalorder %s1062_s27, %s1115_s4 }
 0x136   : > { %p772_p0 = scmp.lt.u32.totalorder %s770_s30, %s766_s29  ;;  %p774_p13 = scmp.lt.u32.totalorder %s766_s29, %s1062_s27 }
 0x137   : > { %p768_p3 = pnand %p767_p1, %p1124_p11 }
 0x138   : > { %p773_p6 = por %p772_p0, %p771_p8 }
 0x139   : > { %p769_p9 = pneg %p768_p3 }
 0x13a   : > { %p775_p2 = por %p774_p13, %p773_p6 }
 0x13c   : > { %p776_p5 = pnand %p775_p2, %p769_p9 }
 0x13e   : > { %779 = shalt.err (!%p776_p5)
}
 0x13f   : > { %625 = dma.vmem_to_hbm [thread:$0]  (%p1124_p11), %s1064_s13, 128, %s1062_s27, %s424_s10  }
 0x140 PF: > { %s469_s12 = sand.u32 1, %s818_s18   ;;  %p1125_p4 = scmp.ne.s32.totalorder %s1121_s8, 0 }
 0x141   : > { %p1126_p7 = scmp.ge.s32.totalorder %s838_s23, 2  ;;  %s470_s15 = scalar_lea.sflag [#allocation4], %s469_s12 }
 0x143   : > { %p634_p10 = pnand %p1126_p7, %p1125_p4 }
 0x145   : > { %809 = dma.done.wait (!%p634_p10), %s470_s15, 128  }
 0x146   : > { %811 = vsyncadd (!%p634_p10), %s470_s15, 4294967168  ;;  %s479_s25 = scalar_lea.sflag [#allocation7], %s469_s12 }
 0x147   : > { %813 = dma.done.wait (!%p634_p10), %s479_s25, 128  }
 0x148   : > { %815 = vsyncadd (!%p634_p10), %s479_s25, 4294967168  ;;  %s25_s23 = sadd.s32 1, %s838_s23   ;;  %s1127_s18 = smov %s822_s19 }
 0x149   : > { %p22_p12 = scmp.ge.s32.totalorder %s25_s23, 4   ;;  %s1128_s19 = smov %s826_s20 }
 0x14a   : > { %s1129_s20 = smov %s932_s7  ;;  %s1130_s21 = smov %s834_s22 }
 0x14b   : > { %s1131_s22 = smov %s1133_s26  ;;  %24 = sbr.rel (!%p22_p12) target bundleno = 8 (0x8), region = 108 }
 0x152   :  { %484 = vsyncpa [#allocation3], 1 }
 0x153   :  { %486 = vsyncpa [#allocation3 + $0x1], 1 }
 0x154   :  { %487 = vsyncpa [#allocation4], 1 }
 0x155   :  { %489 = vsyncpa [#allocation4 + $0x1], 1 }
 0x156   :  { %490 = vsyncpa [#allocation7], 1 }
 0x157   :  { %492 = vsyncpa [#allocation7 + $0x1], 1 }

</bundles_post_ra>
